<compile_context>
chip_gen: v7x
topology: tpu7x:2x2x1
jax: 0.10.0
libtpu: 0.0.40
codegen_flags: <defaults>
</compile_context>

<pallas_src>
import jax
import jax.numpy as jnp
from jax.experimental import pallas as pl
from jax.experimental.pallas import tpu as pltpu

LANE = 128
NUM_FC_HIDDEN = 5


def _round_up(n, m):
    return ((n + m - 1) // m) * m


# ------------------------------ fused kernel --------------------------------

def _make_fused_kernel(input_size, hidden_size, output_size, num_layers):
    rows0 = _round_up(input_size, 16)  # bf16 sublane tile = 16 rows

    def kernel(x_ref, gru_w_ref, fc_w_ref, bias_ref, out_ref):
        h = x_ref[...]                                   # (B, input_size) f32

        # ---- GRU stack: one timestep per layer, h0 == 0 (h-path eliminated).
        row = 0
        for l in range(num_layers):
            n_rows = rows0 if l == 0 else LANE
            w = gru_w_ref[row:row + n_rows, :]           # (n_rows, 3*128) bf16
            row += n_rows
            bg = bias_ref[2 * l:2 * l + 1, :]            # (1, 3*128) f32
            bhn = bias_ref[2 * l + 1:2 * l + 2, 0:LANE]  # (1, 128) f32
            pre = jnp.dot(h.astype(jnp.bfloat16), w,
                          preferred_element_type=jnp.float32) + bg
            r = jax.nn.sigmoid(pre[:, 0:LANE])           # lane-aligned slices
            z = jax.nn.sigmoid(pre[:, LANE:2 * LANE])
            n = jnp.tanh(pre[:, 2 * LANE:3 * LANE] + r * bhn)
            h = (1.0 - z) * n      # (B, 128) f32; lanes >= hidden_size are 0

        # ---- fc head: 5 x (Linear [BN folded] -> ReLU). Dropout = identity.
        brow = 2 * num_layers
        for j in range(NUM_FC_HIDDEN):
            w = fc_w_ref[LANE * j:LANE * (j + 1), :]     # (128, 128) bf16
            b = bias_ref[brow + j:brow + j + 1, 0:LANE]  # (1, 128) f32
            h = jnp.maximum(
                jnp.dot(h.astype(jnp.bfloat16), w,
                        preferred_element_type=jnp.float32) + b, 0.0)

        # ---- final Linear.
        w = fc_w_ref[LANE * NUM_FC_HIDDEN:LANE * (NUM_FC_HIDDEN + 1), :]
        b = bias_ref[brow + NUM_FC_HIDDEN:brow + NUM_FC_HIDDEN + 1, 0:LANE]
        y = jnp.dot(h.astype(jnp.bfloat16), w,
                    preferred_element_type=jnp.float32) + b
        out_ref[...] = y[:, :output_size]

    return kernel


# ------------------------------ parameter init ------------------------------

def init_params(key, input_size, hidden_size, output_size, num_layers):
    """PyTorch-style init (U(-1/sqrt(fan), +1/sqrt(fan))), packed into:
       - gru_w: bf16 slab (rows0 + (L-1)*128, 3*128); gate g of layer l in
         lanes [128g, 128g + H), zero-padded elsewhere; input rows zero-padded.
       - fc_w:  bf16 slab (6*128, 128); each Linear (BN folded) zero-padded to
         a full (128, 128) block.
       - bias:  f32 slab (rows, 3*128); per GRU layer one fused-gate-bias row
         (b_ih+b_hh for r/z, b_in for n) and one b_hn row; one row per fc/out
         bias (BN shift folded).
    """
    H = hidden_size
    assert H <= LANE and 4 * H <= LANE and input_size <= LANE
    assert output_size <= LANE

    def uniform(k, shape, bound):
        return jax.random.uniform(k, shape, jnp.float32, -bound, bound)

    gru_bound = 1.0 / float(H) ** 0.5
    rows0 = _round_up(input_size, 16)

    gru_blocks = []
    bias_rows = []

    for layer in range(num_layers):
        in_sz = input_size if layer == 0 else H
        n_rows = rows0 if layer == 0 else LANE
        key, k1, k2, k3, k4 = jax.random.split(key, 5)
        w_ih = uniform(k1, (3 * H, in_sz), gru_bound)   # rows: [r | z | n]
        # weight_hh is mathematically dead (seq_len==1, h0==0 -> W_hh@h == 0);
        # drawn only to mirror the PyTorch parameter set, then discarded.
        _w_hh = uniform(k2, (3 * H, H), gru_bound)
        b_ih = uniform(k3, (3 * H,), gru_bound)
        b_hh = uniform(k4, (3 * H,), gru_bound)

        w_block = jnp.zeros((n_rows, 3 * LANE), jnp.float32)
        w_block = w_block.at[:in_sz, 0:H].set(w_ih[:H].T)
        w_block = w_block.at[:in_sz, LANE:LANE + H].set(w_ih[H:2 * H].T)
        w_block = w_block.at[:in_sz, 2 * LANE:2 * LANE + H].set(w_ih[2 * H:].T)
        gru_blocks.append(w_block)

        bg = jnp.zeros((1, 3 * LANE), jnp.float32)
        bg = bg.at[0, 0:H].set(b_ih[:H] + b_hh[:H])                 # r bias
        bg = bg.at[0, LANE:LANE + H].set(b_ih[H:2 * H] + b_hh[H:2 * H])  # z
        bg = bg.at[0, 2 * LANE:2 * LANE + H].set(b_ih[2 * H:])      # b_in
        bhn = jnp.zeros((1, 3 * LANE), jnp.float32)
        bhn = bhn.at[0, 0:H].set(b_hh[2 * H:])                      # b_hn
        bias_rows += [bg, bhn]

    # fc hidden blocks: Linear -> BatchNorm1d -> ReLU -> Dropout.
    # BN (eval mode, running stats) folded into the Linear:
    #   scale = gamma * rsqrt(var + eps); W' = W * scale[:,None];
    #   b' = (b - mean) * scale + beta.
    eps = 1e-5
    fc_dims = [(H, H), (H, 2 * H), (2 * H, 4 * H), (4 * H, 2 * H), (2 * H, H)]
    fc_blocks = []
    for fin, fout in fc_dims:
        key, k1, k2 = jax.random.split(key, 3)
        fb = 1.0 / float(fin) ** 0.5
        w = uniform(k1, (fout, fin), fb)
        b = uniform(k2, (fout,), fb)
        gamma = jnp.ones((fout,), jnp.float32)
        beta = jnp.zeros((fout,), jnp.float32)
        mean = jnp.zeros((fout,), jnp.float32)
        var = jnp.ones((fout,), jnp.float32)
        scale = gamma * jax.lax.rsqrt(var + eps)
        w_fold = (w * scale[:, None]).T                 # (fin, fout)
        b_fold = (b - mean) * scale + beta
        w_block = jnp.zeros((LANE, LANE), jnp.float32)
        w_block = w_block.at[:fin, :fout].set(w_fold)
        fc_blocks.append(w_block)
        brow = jnp.zeros((1, 3 * LANE), jnp.float32)
        brow = brow.at[0, :fout].set(b_fold)
        bias_rows.append(brow)

    # final Linear (hidden_size -> output_size)
    key, k1, k2 = jax.random.split(key, 3)
    fb = 1.0 / float(H) ** 0.5
    w_out = uniform(k1, (output_size, H), fb)
    b_out = uniform(k2, (output_size,), fb)
    w_block = jnp.zeros((LANE, LANE), jnp.float32)
    w_block = w_block.at[:H, :output_size].set(w_out.T)
    fc_blocks.append(w_block)
    brow = jnp.zeros((1, 3 * LANE), jnp.float32)
    brow = brow.at[0, :output_size].set(b_out)
    bias_rows.append(brow)

    gru_w = jnp.concatenate(gru_blocks, axis=0).astype(jnp.bfloat16)
    fc_w = jnp.concatenate(fc_blocks, axis=0).astype(jnp.bfloat16)
    bias = jnp.concatenate(bias_rows, axis=0)           # f32
    pad = (-bias.shape[0]) % 8                          # f32 sublane tile = 8
    if pad:
        bias = jnp.concatenate(
            [bias, jnp.zeros((pad, 3 * LANE), jnp.float32)], axis=0)
    return gru_w, fc_w, bias


# --------------------------------- forward ----------------------------------

def make_forward(input_size, hidden_size, output_size, num_layers):
    kernel = _make_fused_kernel(input_size, hidden_size, output_size,
                                num_layers)
    # Everything resident in VMEM; single grid point, no tiling (total
    # parameter + activation footprint ~0.5 MiB << VMEM on all generations).
    vmem = pl.BlockSpec(memory_space=pltpu.MemorySpace.VMEM)

    @jax.jit
    def forward(x, gru_w, fc_w, bias):
        return pl.pallas_call(
            kernel,
            out_shape=jax.ShapeDtypeStruct((x.shape[0], output_size),
                                           jnp.float32),
            in_specs=[vmem, vmem, vmem, vmem],
            out_specs=vmem,
        )(x, gru_w, fc_w, bias)

    return forward


# ----------------------------------- main ------------------------------------

if __name__ == "__main__":
    input_size = 16
    hidden_size = 32
    output_size = 8
    num_layers = 4
    batch = 2

    key = jax.random.PRNGKey(0)
    key, xk = jax.random.split(key)
    x = jax.random.normal(xk, (batch, input_size), jnp.float32)

    gru_w, fc_w, bias = init_params(key, input_size, hidden_size, output_size,
                                    num_layers)
    forward = make_forward(input_size, hidden_size, output_size, num_layers)

    # TODO(synk): BatchNorm is implemented in eval mode (running stats); a
    # train-mode forward (batch statistics + active dropout) is not modeled.
    y = jax.block_until_ready(forward(x, gru_w, fc_w, bias))
    assert y.shape == (batch, output_size), y.shape
    assert bool(jnp.all(jnp.isfinite(y)))
    print("KERNEL_OK")
</pallas_src>

<mosaic_0001>
module attributes {stable_mosaic.version = 11 : i64} {
  func.func @kernel(%arg0: memref<2x16xf32, #tpu.memory_space<vmem>>, %arg1: memref<400x384xbf16, #tpu.memory_space<vmem>>, %arg2: memref<768x128xbf16, #tpu.memory_space<vmem>>, %arg3: memref<16x384xf32, #tpu.memory_space<vmem>>, %arg4: memref<2x8xf32, #tpu.memory_space<vmem>>) attributes {dimension_semantics = [], scalar_prefetch = 0 : i64, scratch_operands = 0 : i64, tpu.core_type = #tpu.core_type<tc>} {
    %c0 = arith.constant 0 : index
    %c0_0 = arith.constant 0 : index
    %0 = vector.load %arg0[%c0, %c0_0] : memref<2x16xf32, #tpu.memory_space<vmem>>, vector<2x16xf32>
    %c0_1 = arith.constant 0 : index
    %c0_2 = arith.constant 0 : index
    %1 = vector.load %arg1[%c0_1, %c0_2] : memref<400x384xbf16, #tpu.memory_space<vmem>>, vector<16x384xbf16>
    %c0_3 = arith.constant 0 : index
    %c0_4 = arith.constant 0 : index
    %2 = vector.load %arg3[%c0_3, %c0_4] : memref<16x384xf32, #tpu.memory_space<vmem>>, vector<1x384xf32>
    %c1 = arith.constant 1 : index
    %c0_5 = arith.constant 0 : index
    %3 = vector.load %arg3[%c1, %c0_5] : memref<16x384xf32, #tpu.memory_space<vmem>>, vector<1x128xf32>
    %4 = arith.truncf %0 : vector<2x16xf32> to vector<2x16xbf16>
    %cst = arith.constant dense<0.000000e+00> : vector<2x384xf32>
    %5 = tpu.matmul %4, %1, %cst {dimension_numbers = #tpu.dot_dimension_numbers<[1], [0], [0], [1], [0, 0, 1, 1], [], []>} : vector<2x16xbf16>, vector<16x384xbf16>, vector<2x384xf32> -> vector<2x384xf32>
    %6 = vector.broadcast %2 : vector<1x384xf32> to vector<2x384xf32>
    %7 = arith.addf %5, %6 : vector<2x384xf32>
    %8 = vector.extract_strided_slice %7 {offsets = [0, 0], sizes = [2, 128], strides = [1, 1]} : vector<2x384xf32> to vector<2x128xf32>
    %9 = arith.negf %8 : vector<2x128xf32>
    %10 = math.exp %9 : vector<2x128xf32>
    %cst_6 = arith.constant 1.000000e+00 : f32
    %11 = vector.broadcast %cst_6 : f32 to vector<2x128xf32>
    %12 = arith.addf %11, %10 : vector<2x128xf32>
    %13 = arith.divf %11, %12 : vector<2x128xf32>
    %14 = vector.extract_strided_slice %7 {offsets = [0, 128], sizes = [2, 128], strides = [1, 1]} : vector<2x384xf32> to vector<2x128xf32>
    %15 = arith.negf %14 : vector<2x128xf32>
    %16 = math.exp %15 : vector<2x128xf32>
    %cst_7 = arith.constant 1.000000e+00 : f32
    %17 = vector.broadcast %cst_7 : f32 to vector<2x128xf32>
    %18 = arith.addf %17, %16 : vector<2x128xf32>
    %19 = arith.divf %17, %18 : vector<2x128xf32>
    %20 = vector.extract_strided_slice %7 {offsets = [0, 256], sizes = [2, 128], strides = [1, 1]} : vector<2x384xf32> to vector<2x128xf32>
    %21 = vector.broadcast %3 : vector<1x128xf32> to vector<2x128xf32>
    %22 = arith.mulf %13, %21 : vector<2x128xf32>
    %23 = arith.addf %20, %22 : vector<2x128xf32>
    %24 = math.tanh %23 : vector<2x128xf32>
    %cst_8 = arith.constant 1.000000e+00 : f32
    %25 = vector.broadcast %cst_8 : f32 to vector<2x128xf32>
    %26 = arith.subf %25, %19 : vector<2x128xf32>
    %27 = arith.mulf %26, %24 : vector<2x128xf32>
    %c16 = arith.constant 16 : index
    %c0_9 = arith.constant 0 : index
    %28 = vector.load %arg1[%c16, %c0_9] : memref<400x384xbf16, #tpu.memory_space<vmem>>, vector<128x384xbf16>
    %c2 = arith.constant 2 : index
    %c0_10 = arith.constant 0 : index
    %29 = vector.load %arg3[%c2, %c0_10] : memref<16x384xf32, #tpu.memory_space<vmem>>, vector<1x384xf32>
    %c3 = arith.constant 3 : index
    %c0_11 = arith.constant 0 : index
    %30 = vector.load %arg3[%c3, %c0_11] : memref<16x384xf32, #tpu.memory_space<vmem>>, vector<1x128xf32>
    %31 = arith.truncf %27 : vector<2x128xf32> to vector<2x128xbf16>
    %cst_12 = arith.constant dense<0.000000e+00> : vector<2x384xf32>
    %32 = tpu.matmul %31, %28, %cst_12 {dimension_numbers = #tpu.dot_dimension_numbers<[1], [0], [0], [1], [0, 0, 1, 1], [], []>} : vector<2x128xbf16>, vector<128x384xbf16>, vector<2x384xf32> -> vector<2x384xf32>
    %33 = vector.broadcast %29 : vector<1x384xf32> to vector<2x384xf32>
    %34 = arith.addf %32, %33 : vector<2x384xf32>
    %35 = vector.extract_strided_slice %34 {offsets = [0, 0], sizes = [2, 128], strides = [1, 1]} : vector<2x384xf32> to vector<2x128xf32>
    %36 = arith.negf %35 : vector<2x128xf32>
    %37 = math.exp %36 : vector<2x128xf32>
    %cst_13 = arith.constant 1.000000e+00 : f32
    %38 = vector.broadcast %cst_13 : f32 to vector<2x128xf32>
    %39 = arith.addf %38, %37 : vector<2x128xf32>
    %40 = arith.divf %38, %39 : vector<2x128xf32>
    %41 = vector.extract_strided_slice %34 {offsets = [0, 128], sizes = [2, 128], strides = [1, 1]} : vector<2x384xf32> to vector<2x128xf32>
    %42 = arith.negf %41 : vector<2x128xf32>
    %43 = math.exp %42 : vector<2x128xf32>
    %cst_14 = arith.constant 1.000000e+00 : f32
    %44 = vector.broadcast %cst_14 : f32 to vector<2x128xf32>
    %45 = arith.addf %44, %43 : vector<2x128xf32>
    %46 = arith.divf %44, %45 : vector<2x128xf32>
    %47 = vector.extract_strided_slice %34 {offsets = [0, 256], sizes = [2, 128], strides = [1, 1]} : vector<2x384xf32> to vector<2x128xf32>
    %48 = vector.broadcast %30 : vector<1x128xf32> to vector<2x128xf32>
    %49 = arith.mulf %40, %48 : vector<2x128xf32>
    %50 = arith.addf %47, %49 : vector<2x128xf32>
    %51 = math.tanh %50 : vector<2x128xf32>
    %cst_15 = arith.constant 1.000000e+00 : f32
    %52 = vector.broadcast %cst_15 : f32 to vector<2x128xf32>
    %53 = arith.subf %52, %46 : vector<2x128xf32>
    %54 = arith.mulf %53, %51 : vector<2x128xf32>
    %c144 = arith.constant 144 : index
    %c0_16 = arith.constant 0 : index
    %55 = vector.load %arg1[%c144, %c0_16] : memref<400x384xbf16, #tpu.memory_space<vmem>>, vector<128x384xbf16>
    %c4 = arith.constant 4 : index
    %c0_17 = arith.constant 0 : index
    %56 = vector.load %arg3[%c4, %c0_17] : memref<16x384xf32, #tpu.memory_space<vmem>>, vector<1x384xf32>
    %c5 = arith.constant 5 : index
    %c0_18 = arith.constant 0 : index
    %57 = vector.load %arg3[%c5, %c0_18] : memref<16x384xf32, #tpu.memory_space<vmem>>, vector<1x128xf32>
    %58 = arith.truncf %54 : vector<2x128xf32> to vector<2x128xbf16>
    %cst_19 = arith.constant dense<0.000000e+00> : vector<2x384xf32>
    %59 = tpu.matmul %58, %55, %cst_19 {dimension_numbers = #tpu.dot_dimension_numbers<[1], [0], [0], [1], [0, 0, 1, 1], [], []>} : vector<2x128xbf16>, vector<128x384xbf16>, vector<2x384xf32> -> vector<2x384xf32>
    %60 = vector.broadcast %56 : vector<1x384xf32> to vector<2x384xf32>
    %61 = arith.addf %59, %60 : vector<2x384xf32>
    %62 = vector.extract_strided_slice %61 {offsets = [0, 0], sizes = [2, 128], strides = [1, 1]} : vector<2x384xf32> to vector<2x128xf32>
    %63 = arith.negf %62 : vector<2x128xf32>
    %64 = math.exp %63 : vector<2x128xf32>
    %cst_20 = arith.constant 1.000000e+00 : f32
    %65 = vector.broadcast %cst_20 : f32 to vector<2x128xf32>
    %66 = arith.addf %65, %64 : vector<2x128xf32>
    %67 = arith.divf %65, %66 : vector<2x128xf32>
    %68 = vector.extract_strided_slice %61 {offsets = [0, 128], sizes = [2, 128], strides = [1, 1]} : vector<2x384xf32> to vector<2x128xf32>
    %69 = arith.negf %68 : vector<2x128xf32>
    %70 = math.exp %69 : vector<2x128xf32>
    %cst_21 = arith.constant 1.000000e+00 : f32
    %71 = vector.broadcast %cst_21 : f32 to vector<2x128xf32>
    %72 = arith.addf %71, %70 : vector<2x128xf32>
    %73 = arith.divf %71, %72 : vector<2x128xf32>
    %74 = vector.extract_strided_slice %61 {offsets = [0, 256], sizes = [2, 128], strides = [1, 1]} : vector<2x384xf32> to vector<2x128xf32>
    %75 = vector.broadcast %57 : vector<1x128xf32> to vector<2x128xf32>
    %76 = arith.mulf %67, %75 : vector<2x128xf32>
    %77 = arith.addf %74, %76 : vector<2x128xf32>
    %78 = math.tanh %77 : vector<2x128xf32>
    %cst_22 = arith.constant 1.000000e+00 : f32
    %79 = vector.broadcast %cst_22 : f32 to vector<2x128xf32>
    %80 = arith.subf %79, %73 : vector<2x128xf32>
    %81 = arith.mulf %80, %78 : vector<2x128xf32>
    %c272 = arith.constant 272 : index
    %c0_23 = arith.constant 0 : index
    %82 = vector.load %arg1[%c272, %c0_23] : memref<400x384xbf16, #tpu.memory_space<vmem>>, vector<128x384xbf16>
    %c6 = arith.constant 6 : index
    %c0_24 = arith.constant 0 : index
    %83 = vector.load %arg3[%c6, %c0_24] : memref<16x384xf32, #tpu.memory_space<vmem>>, vector<1x384xf32>
    %c7 = arith.constant 7 : index
    %c0_25 = arith.constant 0 : index
    %84 = vector.load %arg3[%c7, %c0_25] : memref<16x384xf32, #tpu.memory_space<vmem>>, vector<1x128xf32>
    %85 = arith.truncf %81 : vector<2x128xf32> to vector<2x128xbf16>
    %cst_26 = arith.constant dense<0.000000e+00> : vector<2x384xf32>
    %86 = tpu.matmul %85, %82, %cst_26 {dimension_numbers = #tpu.dot_dimension_numbers<[1], [0], [0], [1], [0, 0, 1, 1], [], []>} : vector<2x128xbf16>, vector<128x384xbf16>, vector<2x384xf32> -> vector<2x384xf32>
    %87 = vector.broadcast %83 : vector<1x384xf32> to vector<2x384xf32>
    %88 = arith.addf %86, %87 : vector<2x384xf32>
    %89 = vector.extract_strided_slice %88 {offsets = [0, 0], sizes = [2, 128], strides = [1, 1]} : vector<2x384xf32> to vector<2x128xf32>
    %90 = arith.negf %89 : vector<2x128xf32>
    %91 = math.exp %90 : vector<2x128xf32>
    %cst_27 = arith.constant 1.000000e+00 : f32
    %92 = vector.broadcast %cst_27 : f32 to vector<2x128xf32>
    %93 = arith.addf %92, %91 : vector<2x128xf32>
    %94 = arith.divf %92, %93 : vector<2x128xf32>
    %95 = vector.extract_strided_slice %88 {offsets = [0, 128], sizes = [2, 128], strides = [1, 1]} : vector<2x384xf32> to vector<2x128xf32>
    %96 = arith.negf %95 : vector<2x128xf32>
    %97 = math.exp %96 : vector<2x128xf32>
    %cst_28 = arith.constant 1.000000e+00 : f32
    %98 = vector.broadcast %cst_28 : f32 to vector<2x128xf32>
    %99 = arith.addf %98, %97 : vector<2x128xf32>
    %100 = arith.divf %98, %99 : vector<2x128xf32>
    %101 = vector.extract_strided_slice %88 {offsets = [0, 256], sizes = [2, 128], strides = [1, 1]} : vector<2x384xf32> to vector<2x128xf32>
    %102 = vector.broadcast %84 : vector<1x128xf32> to vector<2x128xf32>
    %103 = arith.mulf %94, %102 : vector<2x128xf32>
    %104 = arith.addf %101, %103 : vector<2x128xf32>
    %105 = math.tanh %104 : vector<2x128xf32>
    %cst_29 = arith.constant 1.000000e+00 : f32
    %106 = vector.broadcast %cst_29 : f32 to vector<2x128xf32>
    %107 = arith.subf %106, %100 : vector<2x128xf32>
    %108 = arith.mulf %107, %105 : vector<2x128xf32>
    %c0_30 = arith.constant 0 : index
    %c0_31 = arith.constant 0 : index
    %109 = vector.load %arg2[%c0_30, %c0_31] : memref<768x128xbf16, #tpu.memory_space<vmem>>, vector<128x128xbf16>
    %c8 = arith.constant 8 : index
    %c0_32 = arith.constant 0 : index
    %110 = vector.load %arg3[%c8, %c0_32] : memref<16x384xf32, #tpu.memory_space<vmem>>, vector<1x128xf32>
    %111 = arith.truncf %108 : vector<2x128xf32> to vector<2x128xbf16>
    %cst_33 = arith.constant dense<0.000000e+00> : vector<2x128xf32>
    %112 = tpu.matmul %111, %109, %cst_33 {dimension_numbers = #tpu.dot_dimension_numbers<[1], [0], [0], [1], [0, 0, 1, 1], [], []>} : vector<2x128xbf16>, vector<128x128xbf16>, vector<2x128xf32> -> vector<2x128xf32>
    %113 = vector.broadcast %110 : vector<1x128xf32> to vector<2x128xf32>
    %114 = arith.addf %112, %113 : vector<2x128xf32>
    %cst_34 = arith.constant 0.000000e+00 : f32
    %115 = vector.broadcast %cst_34 : f32 to vector<2x128xf32>
    %116 = arith.maximumf %114, %115 : vector<2x128xf32>
    %c128 = arith.constant 128 : index
    %c0_35 = arith.constant 0 : index
    %117 = vector.load %arg2[%c128, %c0_35] : memref<768x128xbf16, #tpu.memory_space<vmem>>, vector<128x128xbf16>
    %c9 = arith.constant 9 : index
    %c0_36 = arith.constant 0 : index
    %118 = vector.load %arg3[%c9, %c0_36] : memref<16x384xf32, #tpu.memory_space<vmem>>, vector<1x128xf32>
    %119 = arith.truncf %116 : vector<2x128xf32> to vector<2x128xbf16>
    %cst_37 = arith.constant dense<0.000000e+00> : vector<2x128xf32>
    %120 = tpu.matmul %119, %117, %cst_37 {dimension_numbers = #tpu.dot_dimension_numbers<[1], [0], [0], [1], [0, 0, 1, 1], [], []>} : vector<2x128xbf16>, vector<128x128xbf16>, vector<2x128xf32> -> vector<2x128xf32>
    %121 = vector.broadcast %118 : vector<1x128xf32> to vector<2x128xf32>
    %122 = arith.addf %120, %121 : vector<2x128xf32>
    %cst_38 = arith.constant 0.000000e+00 : f32
    %123 = vector.broadcast %cst_38 : f32 to vector<2x128xf32>
    %124 = arith.maximumf %122, %123 : vector<2x128xf32>
    %c256 = arith.constant 256 : index
    %c0_39 = arith.constant 0 : index
    %125 = vector.load %arg2[%c256, %c0_39] : memref<768x128xbf16, #tpu.memory_space<vmem>>, vector<128x128xbf16>
    %c10 = arith.constant 10 : index
    %c0_40 = arith.constant 0 : index
    %126 = vector.load %arg3[%c10, %c0_40] : memref<16x384xf32, #tpu.memory_space<vmem>>, vector<1x128xf32>
    %127 = arith.truncf %124 : vector<2x128xf32> to vector<2x128xbf16>
    %cst_41 = arith.constant dense<0.000000e+00> : vector<2x128xf32>
    %128 = tpu.matmul %127, %125, %cst_41 {dimension_numbers = #tpu.dot_dimension_numbers<[1], [0], [0], [1], [0, 0, 1, 1], [], []>} : vector<2x128xbf16>, vector<128x128xbf16>, vector<2x128xf32> -> vector<2x128xf32>
    %129 = vector.broadcast %126 : vector<1x128xf32> to vector<2x128xf32>
    %130 = arith.addf %128, %129 : vector<2x128xf32>
    %cst_42 = arith.constant 0.000000e+00 : f32
    %131 = vector.broadcast %cst_42 : f32 to vector<2x128xf32>
    %132 = arith.maximumf %130, %131 : vector<2x128xf32>
    %c384 = arith.constant 384 : index
    %c0_43 = arith.constant 0 : index
    %133 = vector.load %arg2[%c384, %c0_43] : memref<768x128xbf16, #tpu.memory_space<vmem>>, vector<128x128xbf16>
    %c11 = arith.constant 11 : index
    %c0_44 = arith.constant 0 : index
    %134 = vector.load %arg3[%c11, %c0_44] : memref<16x384xf32, #tpu.memory_space<vmem>>, vector<1x128xf32>
    %135 = arith.truncf %132 : vector<2x128xf32> to vector<2x128xbf16>
    %cst_45 = arith.constant dense<0.000000e+00> : vector<2x128xf32>
    %136 = tpu.matmul %135, %133, %cst_45 {dimension_numbers = #tpu.dot_dimension_numbers<[1], [0], [0], [1], [0, 0, 1, 1], [], []>} : vector<2x128xbf16>, vector<128x128xbf16>, vector<2x128xf32> -> vector<2x128xf32>
    %137 = vector.broadcast %134 : vector<1x128xf32> to vector<2x128xf32>
    %138 = arith.addf %136, %137 : vector<2x128xf32>
    %cst_46 = arith.constant 0.000000e+00 : f32
    %139 = vector.broadcast %cst_46 : f32 to vector<2x128xf32>
    %140 = arith.maximumf %138, %139 : vector<2x128xf32>
    %c512 = arith.constant 512 : index
    %c0_47 = arith.constant 0 : index
    %141 = vector.load %arg2[%c512, %c0_47] : memref<768x128xbf16, #tpu.memory_space<vmem>>, vector<128x128xbf16>
    %c12 = arith.constant 12 : index
    %c0_48 = arith.constant 0 : index
    %142 = vector.load %arg3[%c12, %c0_48] : memref<16x384xf32, #tpu.memory_space<vmem>>, vector<1x128xf32>
    %143 = arith.truncf %140 : vector<2x128xf32> to vector<2x128xbf16>
    %cst_49 = arith.constant dense<0.000000e+00> : vector<2x128xf32>
    %144 = tpu.matmul %143, %141, %cst_49 {dimension_numbers = #tpu.dot_dimension_numbers<[1], [0], [0], [1], [0, 0, 1, 1], [], []>} : vector<2x128xbf16>, vector<128x128xbf16>, vector<2x128xf32> -> vector<2x128xf32>
    %145 = vector.broadcast %142 : vector<1x128xf32> to vector<2x128xf32>
    %146 = arith.addf %144, %145 : vector<2x128xf32>
    %cst_50 = arith.constant 0.000000e+00 : f32
    %147 = vector.broadcast %cst_50 : f32 to vector<2x128xf32>
    %148 = arith.maximumf %146, %147 : vector<2x128xf32>
    %c640 = arith.constant 640 : index
    %c0_51 = arith.constant 0 : index
    %149 = vector.load %arg2[%c640, %c0_51] : memref<768x128xbf16, #tpu.memory_space<vmem>>, vector<128x128xbf16>
    %c13 = arith.constant 13 : index
    %c0_52 = arith.constant 0 : index
    %150 = vector.load %arg3[%c13, %c0_52] : memref<16x384xf32, #tpu.memory_space<vmem>>, vector<1x128xf32>
    %151 = arith.truncf %148 : vector<2x128xf32> to vector<2x128xbf16>
    %cst_53 = arith.constant dense<0.000000e+00> : vector<2x128xf32>
    %152 = tpu.matmul %151, %149, %cst_53 {dimension_numbers = #tpu.dot_dimension_numbers<[1], [0], [0], [1], [0, 0, 1, 1], [], []>} : vector<2x128xbf16>, vector<128x128xbf16>, vector<2x128xf32> -> vector<2x128xf32>
    %153 = vector.broadcast %150 : vector<1x128xf32> to vector<2x128xf32>
    %154 = arith.addf %152, %153 : vector<2x128xf32>
    %155 = vector.extract_strided_slice %154 {offsets = [0, 0], sizes = [2, 8], strides = [1, 1]} : vector<2x128xf32> to vector<2x8xf32>
    %c0_54 = arith.constant 0 : index
    %c0_55 = arith.constant 0 : index
    %156 = vector.load %arg4[%c0_54, %c0_55] : memref<2x8xf32, #tpu.memory_space<vmem>>, vector<2x8xf32>
    tpu.vector_store %arg4[%c0_54, %c0_55], %155 {strides = array<i32>} : memref<2x8xf32, #tpu.memory_space<vmem>>, vector<2x8xf32>,
    return
  }
}

</mosaic_0001>

<bundles_post_ra>
// kernel: forward.1
= control target key start
LH: loop header
LB: loop body
LE: loop exit
PB: predicated region body
PF: predicated region fallthrough
CT: control target
= control target key end

     0   :  { %9 = vsyncpa [#allocation3], 0  ;;  %s2644_s0 = inlined_call_operand.hbm [shape: f32[2,16], index: 0, kind: input, shape index: {}]   ;;  %s2645_s1 = inlined_call_operand.hbm [shape: bf16[400,384], index: 1, kind: input, shape index: {}]   ;;  %s2646_s2 = inlined_call_operand.hbm [shape: bf16[768,128], index: 2, kind: input, shape index: {}]   ;;  %s2647_s3 = inlined_call_operand.hbm [shape: f32[16,384], index: 3, kind: input, shape index: {}]   ;;  %s2648_s4 = inlined_call_operand.hbm [shape: f32[2,8], index: 4, kind: output, shape index: {}]  }
   0x1   :  { %10 = vsyncpa [#allocation6], 0 }
   0x2   :  { %11 = vsyncpa [#allocation9], 0 }
   0x3   :  { %12 = vsyncpa [#allocation4], 0  ;;  %s2430_s15 = smov [#allocation5]   ;;  %s2312_s19 = scalar_lea.hbm %s2645_s1, 9600 }
   0x4   :  { %s28_s16 = sshll.u32 %s2430_s15, 4  ;;  %p2313_p0 = scmp.ne.s32.totalorder %s2645_s1, %s2312_s19  ;;  %s29_s16 = int_to_ptr.vmem [resolvable:$true] %s28_s16 }
   0x5   :  { %p2316_p1 = scmp.lt.u32.totalorder %s2312_s19, %s2645_s1 }
   0x7   :  { %p2318_p2 = pnand %p2316_p1, %p2313_p0 }
   0x9   :  { %2321 = shalt.err (!%p2318_p2)
}
   0xa   :  { %s2322_s24 = scalar_lea.vmem %s29_s16, 9600  ;;  %p2327_p4 = scmp.lt.s32.totalorder %s29_s16, %s29_s16 }
   0xb   :  { %p2323_p3 = scmp.ne.s32.totalorder %s29_s16, %s2322_s24  ;;  %p2328_p5 = scmp.lt.s32.totalorder %s2322_s24, %s2322_s24 }
   0xd   :  { %p2329_p6 = por %p2328_p5, %p2327_p4 }
   0xf   :  { %p2330_p7 = pnand %p2329_p6, %p2323_p3 }
  0x11   :  { %2333 = shalt.err (!%p2330_p7)
}
  0x12   :  { %s2431_s25 = smov 192   ;;  %s2432_s26 = smov 12  }
  0x13   :  { %34 = dma.hbm_to_vmem [thread:$0]  %s2645_s1, 9600, %s29_s16, [#allocation6], %s2431_s25, %s2431_s25, %s2432_s26  }
  0x14   :  { %s2433_s29 = smov [#allocation2]   ;;  %s2434_s5 = smov [#allocation7]  }
  0x15   :  { %s19_s30 = sshll.u32 %s2433_s29, 4  ;;  %s40_s6 = sshll.u32 %s2434_s5, 4  ;;  %s20_s30 = int_to_ptr.vmem [resolvable:$true] %s19_s30  ;;  %s41_s6 = int_to_ptr.vmem [resolvable:$true] %s40_s6 }
  0x16   :  { %s2334_s9 = scalar_lea.hbm %s2644_s0, 32 }
  0x17   :  { %p2335_p8 = scmp.ne.s32.totalorder %s2644_s0, %s2334_s9  ;;  %p2338_p9 = scmp.lt.u32.totalorder %s2334_s9, %s2644_s0 }
  0x19   :  { %p2340_p10 = pnand %p2338_p9, %p2335_p8 }
  0x1b   :  { %2343 = shalt.err (!%p2340_p10)
}
  0x1c   :  { %s2344_s1 = scalar_lea.vmem %s20_s30, 32  ;;  %p2349_p12 = scmp.lt.s32.totalorder %s20_s30, %s20_s30 }
  0x1d   :  { %p2345_p11 = scmp.ne.s32.totalorder %s20_s30, %s2344_s1  ;;  %p2350_p13 = scmp.lt.s32.totalorder %s2344_s1, %s2344_s1 }
  0x1f   :  { %p2351_p0 = por %p2350_p13, %p2349_p12 }
  0x21   :  { %p2352_p1 = pnand %p2351_p0, %p2345_p11 }
  0x23   :  { %2355 = shalt.err (!%p2352_p1)
}
  0x24   :  { %22 = dma.hbm_to_vmem [thread:$0]  %s2644_s0, 32, %s20_s30, [#allocation3]  }
  0x25   :  { %s2356_s18 = scalar_lea.hbm %s2646_s2, 6144 }
  0x26   :  { %p2357_p2 = scmp.ne.s32.totalorder %s2646_s2, %s2356_s18  ;;  %p2360_p3 = scmp.lt.u32.totalorder %s2356_s18, %s2646_s2 }
  0x28   :  { %p2362_p4 = pnand %p2360_p3, %p2357_p2 }
  0x2a   :  { %2365 = shalt.err (!%p2362_p4)
}
  0x2b   :  { %s2366_s23 = scalar_lea.vmem %s41_s6, 6144  ;;  %p2371_p6 = scmp.lt.s32.totalorder %s41_s6, %s41_s6 }
  0x2c   :  { %p2367_p5 = scmp.ne.s32.totalorder %s41_s6, %s2366_s23  ;;  %p2372_p7 = scmp.lt.s32.totalorder %s2366_s23, %s2366_s23 }
  0x2e   :  { %p2373_p8 = por %p2372_p7, %p2371_p6 }
  0x30   :  { %p2374_p9 = pnand %p2373_p8, %p2367_p5 }
  0x32   :  { %2377 = shalt.err (!%p2374_p9)
}
  0x33   :  { %s2435_s0 = smov 64   ;;  %s2436_s24 = smov 4  }
  0x34   :  { %46 = dma.hbm_to_vmem [thread:$0]  %s2646_s2, 6144, %s41_s6, [#allocation6], %s2435_s0, %s2435_s0, %s2436_s24  }
  0x35   :  { %s2437_s27 = smov [#allocation8]   ;;  %s2378_s5 = scalar_lea.hbm %s2647_s3, 768 }
  0x36   :  { %s52_s28 = sshll.u32 %s2437_s27, 4  ;;  %p2379_p10 = scmp.ne.s32.totalorder %s2647_s3, %s2378_s5  ;;  %s53_s28 = int_to_ptr.vmem [resolvable:$true] %s52_s28 }
  0x37   :  { %p2382_p11 = scmp.lt.u32.totalorder %s2378_s5, %s2647_s3 }
  0x39   :  { %p2384_p12 = pnand %p2382_p11, %p2379_p10 }
  0x3b   :  { %2387 = shalt.err (!%p2384_p12)
}
  0x3c   :  { %s2388_s11 = scalar_lea.vmem %s53_s28, 768  ;;  %p2393_p0 = scmp.lt.s32.totalorder %s53_s28, %s53_s28 }
  0x3d   :  { %p2389_p13 = scmp.ne.s32.totalorder %s53_s28, %s2388_s11  ;;  %p2394_p1 = scmp.lt.s32.totalorder %s2388_s11, %s2388_s11 }
  0x3f   :  { %p2395_p2 = por %p2394_p1, %p2393_p0 }
  0x41   :  { %p2396_p3 = pnand %p2395_p2, %p2389_p13 }
  0x43   :  { %2399 = shalt.err (!%p2396_p3)
}
  0x44   :  { %s2438_s2 = smov 384   ;;  %s2439_s6 = smov 24  }
  0x45   :  { %58 = dma.hbm_to_vmem [thread:$0]  %s2647_s3, 768, %s53_s28, [#allocation9], %s2438_s2, %s2438_s2, %s2439_s6  }
  0x46   :  { %2422 = dma.done.wait [#allocation3], 32  }
  0x47   :  { %2423 = vsyncadd [#allocation3], 4294967264 }
  0x48   :  { %2424 = dma.done.wait [#allocation6], 15744  }
  0x49   :  { %2425 = vsyncadd [#allocation6], 4294951552 }
  0x4a   :  { %2426 = dma.done.wait [#allocation9], 768  }
  0x4b   :  { %2427 = vsyncadd [#allocation9], 4294966528  ;;  %v2440_v0 = vmov 0   ;;  %v2441_v1 = vmov 0.0   ;;  %vm2442_vm0 = vmmov 0   ;;  %vm112_vm1 = vcmask 130048  }
  0x4c   :  { %148 = vmatprep.mubr.bf16.mxu0 %v2440_v0  ;;  %1924 = vmatprep.subr.bf16.mxu1 %v2441_v1  ;;  %v2124_v2 = vld [vmem:[#allocation5 + $0x4] ss:$12 sps:$4 sm:$0xff]   ;;  %v2126_v3 = vld [vmem:[#allocation5] ss:$12 sps:$4 sm:$0xff]   ;;  %v72_v4 = vld [vmem:[#allocation2] sm:$0x3]  ;;  %v81_v31 = vlaneseq }
  0x4d   :  { %1926 = vmatprep.mubr.msk.bf16.mxu1 %vm2442_vm0, %v2441_v1  ;;  %116 = vmatprep.subr.bf16.mxu0 %v2124_v2  ;;  %v79_v5 = vpack.c.bf16 %v72_v4, %v72_v4  ;;  %v2127_v6 = vld [vmem:[#allocation5 + $0x8] ss:$12 sps:$4 sm:$0xff]   ;;  %v2128_v8 = vld [vmem:[#allocation5 + $0x18] ss:$12 sps:$4 sm:$0xff]   ;;  %v2131_v9 = vld [vmem:[#allocation5 + $0x20] ss:$12 sps:$4 sm:$0xff]  }
  0x4e   :  { %117 = vmatpush1.bf16.msra.mxu0 %v2126_v3  ;;  %1925 = vmatpush3.bf16.msra.mxu1 %v2127_v6  ;;  %v2130_v7 = vld [vmem:[#allocation5 + $0x1c] ss:$12 sps:$4 sm:$0xff]   ;;  %v2134_v10 = vld [vmem:[#allocation5 + $0x34] ss:$12 sps:$4 sm:$0xff]   ;;  %v2135_v12 = vld [vmem:[#allocation5 + $0x38] ss:$12 sps:$4 sm:$0xff]  }
  0x4f   :  { %1930 = vmatprep.subr.bf16.mxu1 %v2441_v1  ;;  %394 = vmatprep.subr.bf16.mxu0 %v2130_v7  ;;  %v2132_v11 = vld [vmem:[#allocation5 + $0x30] ss:$12 sps:$4 sm:$0xff]   ;;  %v2138_v13 = vld [vmem:[#allocation5 + $0x4c] ss:$12 sps:$4 sm:$0xff]   ;;  %v2136_v14 = vld [vmem:[#allocation5 + $0x48] ss:$12 sps:$4 sm:$0xff]  }
  0x50   :  { %v2139_v15 = vld [vmem:[#allocation5 + $0x50] ss:$12 sps:$4 sm:$0xff]   ;;  %v2140_v17 = vld [vmem:[#allocation5 + $0x60] ss:$12 sps:$4 sm:$0xff]   ;;  %v2143_v18 = vld [vmem:[#allocation5 + $0x68] ss:$12 sps:$4 sm:$0xff]  }
  0x51   :  { %1711 = vmatmul.mubr.msk.bf16.vlgmr.msra.gmra.mrb[0].mxu0 %vm112_vm1, %v79_v5  ;;  %1927 = vmatmul.mubr.msk.bf16.vlgmr.msra.gmra.mrb[0].mxu1 %vm112_vm1, %v79_v5  ;;  %v2142_v16 = vld [vmem:[#allocation5 + $0x64] ss:$12 sps:$4 sm:$0xff]   ;;  %v2146_v19 = vld [vmem:[#allocation5 + $0x7c] ss:$12 sps:$4 sm:$0xff]   ;;  %v2147_v21 = vld [vmem:[#allocation5 + $0x80] ss:$12 sps:$4 sm:$0xff]  }
  0x52   :  { %426 = vmatprep.mubr.bf16.mxu0 %v2440_v0  ;;  %1946 = vmatprep.mubr.msk.bf16.mxu1 %vm2442_vm0, %v2441_v1  ;;  %v2144_v20 = vld [vmem:[#allocation5 + $0x78] ss:$12 sps:$4 sm:$0xff]   ;;  %v2148_v22 = vld [vmem:[#allocation5 + $0x90] ss:$12 sps:$4 sm:$0xff]   ;;  %v2150_v23 = vld [vmem:[#allocation5 + $0x94] ss:$12 sps:$4 sm:$0xff]  }
  0x53   :  { %395 = vmatpush1.bf16.msra.mxu0 %v2128_v8  ;;  %1931 = vmatpush3.bf16.msra.mxu1 %v2131_v9  ;;  %v2151_v24 = vld [vmem:[#allocation5 + $0x98] ss:$12 sps:$4 sm:$0xff]   ;;  %v2152_v26 = vld [vmem:[#allocation5 + $0xa8] ss:$12 sps:$4 sm:$0xff]   ;;  %v2155_v27 = vld [vmem:[#allocation5 + $0xb0] ss:$12 sps:$4 sm:$0xff]  }
  0x54   :  { %1932 = vmatprep.subr.bf16.mxu1 %v2441_v1  ;;  %396 = vmatprep.subr.bf16.mxu0 %v2134_v10  ;;  %v2154_v25 = vld [vmem:[#allocation5 + $0xac] ss:$12 sps:$4 sm:$0xff]   ;;  %v2158_v28 = vld [vmem:[#allocation5 + $0xc4] ss:$12 sps:$4 sm:$0xff]   ;;  %v2159_v30 = vld [vmem:[#allocation5 + $0xc8] ss:$12 sps:$4 sm:$0xff]  }
  0x55   :  { %v2156_v29 = vld [vmem:[#allocation5 + $0xc0] ss:$12 sps:$4 sm:$0xff]   ;;  %v82_v32 = vshrl.u32 %v81_v31, 7  ;;  %v78_v56 = vld [vmem:[#allocation8 + $0x1] ss:$0 sm:$0xff]  ;;  %s2443_s3 = smov [#allocation10]  }
  0x56   :  { %v77_v34 = vld [vmem:[#allocation8] ss:$8 sm:$0x7]  ;;  %v2164_v8 = vld [vmem:[#allocation5 + $0xf0] ss:$12 sps:$4 sm:$0xff]   ;;  %s1697_s1 = sshll.u32 %s2443_s3, 4  ;;  %s1698_s1 = int_to_ptr.vmem [resolvable:$true] %s1697_s1 }
  0x57   :  { %397 = vmatpush1.bf16.msra.mxu0 %v2132_v11  ;;  %1933 = vmatpush3.bf16.msra.mxu1 %v2135_v12  ;;  %v2533_v33 = vsub.s32 0, %v82_v32  ;;  %v2535_v35 = vsub.s32 1, %v82_v32  ;;  %v2539_v52 = vsub.s32 2, %v82_v32  ;;  %v2162_v4 = vld [vmem:[#allocation5 + $0xdc] ss:$12 sps:$4 sm:$0xff]   ;;  %vm1689_vm2 = vcmask 58368   ;;  %p2405_p5 = scmp.lt.s32.totalorder %s1698_s1, %s1698_s1 }
  0x58   :  { %1934 = vmatprep.subr.bf16.mxu1 %v2441_v1  ;;  %398 = vmatprep.subr.bf16.mxu0 %v2138_v13  ;;  %v2160_v5 = vld [vmem:[#allocation5 + $0xd8] ss:$12 sps:$4 sm:$0xff]   ;;  %v2163_v6 = vld [vmem:[#allocation5 + $0xe0] ss:$12 sps:$4 sm:$0xff]   ;;  %v2168_v11 = vld [vmem:[#allocation5 + $0x108] ss:$12 sps:$4 sm:$0xff]  }
  0x59   :  { %v84_v36 = vrot.slane %v77_v34, %v2533_v33  ;;  %v88_v38 = vrot.slane %v77_v34, %v2535_v35  ;;  %v92_v54 = vrot.slane %v77_v34, %v2539_v52  ;;  %v2166_v7 = vld [vmem:[#allocation5 + $0xf4] ss:$12 sps:$4 sm:$0xff]   ;;  %v2167_v9 = vld [vmem:[#allocation5 + $0xf8] ss:$12 sps:$4 sm:$0xff]   ;;  %v2171_v12 = vld [vmem:[#allocation5 + $0x110] ss:$12 sps:$4 sm:$0xff]  }
  0x5a   :  { %v2170_v10 = vld [vmem:[#allocation5 + $0x10c] ss:$12 sps:$4 sm:$0xff]   ;;  %v2174_v13 = vld [vmem:[#allocation5 + $0x124] ss:$12 sps:$4 sm:$0xff]   ;;  %s2400_s14 = scalar_lea.vmem %s1698_s1, 32 }
  0x5b   :  { %399 = vmatpush1.bf16.msra.mxu0 %v2136_v14  ;;  %1935 = vmatpush3.bf16.msra.mxu1 %v2139_v15  ;;  %v2172_v14 = vld [vmem:[#allocation5 + $0x120] ss:$12 sps:$4 sm:$0xff]   ;;  %v2175_v15 = vld [vmem:[#allocation5 + $0x128] ss:$12 sps:$4 sm:$0xff]   ;;  %p2401_p4 = scmp.ne.s32.totalorder %s1698_s1, %s2400_s14  ;;  %p2406_p6 = scmp.lt.s32.totalorder %s2400_s14, %s2400_s14 }
  0x5c   :  { %1936 = vmatprep.subr.bf16.mxu1 %v2441_v1  ;;  %400 = vmatprep.subr.bf16.mxu0 %v2142_v16  ;;  %v2178_v16 = vld [vmem:[#allocation5 + $0x13c] ss:$12 sps:$4 sm:$0xff]  }
  0x5d   :  { %p2407_p7 = por %p2406_p6, %p2405_p5 }
  0x5f   :  { %401 = vmatpush1.bf16.msra.mxu0 %v2140_v17  ;;  %1937 = vmatpush3.bf16.msra.mxu1 %v2143_v18  ;;  %v2176_v17 = vld [vmem:[#allocation5 + $0x138] ss:$12 sps:$4 sm:$0xff]   ;;  %v2179_v18 = vld [vmem:[#allocation5 + $0x140] ss:$12 sps:$4 sm:$0xff]   ;;  %p2408_p8 = pnand %p2407_p7, %p2401_p4 }
  0x60   :  { %1938 = vmatprep.subr.bf16.mxu1 %v2441_v1  ;;  %402 = vmatprep.subr.bf16.mxu0 %v2146_v19  ;;  %v2180_v19 = vld [vmem:[#allocation5 + $0x150] ss:$12 sps:$4 sm:$0xff]  }
  0x63   :  { %403 = vmatpush1.bf16.msra.mxu0 %v2144_v20  ;;  %1939 = vmatpush3.bf16.msra.mxu1 %v2147_v21  ;;  %v2182_v20 = vld [vmem:[#allocation5 + $0x154] ss:$12 sps:$4 sm:$0xff]   ;;  %v2183_v21 = vld [vmem:[#allocation5 + $0x158] ss:$12 sps:$4 sm:$0xff]  }
  0x64   :  { %1940 = vmatprep.subr.bf16.mxu1 %v2441_v1  ;;  %404 = vmatprep.subr.bf16.mxu0 %v2150_v23  ;;  %v2184_v23 = vld [vmem:[#allocation5 + $0x168] ss:$12 sps:$4 sm:$0xff]  }
  0x67   :  { %405 = vmatpush1.bf16.msra.mxu0 %v2148_v22  ;;  %1941 = vmatpush3.bf16.msra.mxu1 %v2151_v24  ;;  %v2186_v22 = vld [vmem:[#allocation5 + $0x16c] ss:$12 sps:$4 sm:$0xff]   ;;  %v2187_v24 = vld [vmem:[#allocation5 + $0x170] ss:$12 sps:$4 sm:$0xff]  }
  0x68   :  { %406 = vmatprep.subr.bf16.mxu0 %v2154_v25  ;;  %1942 = vmatprep.subr.bf16.mxu1 %v2441_v1  ;;  %v2190_v25 = vld [vmem:[#allocation5 + $0x184] ss:$12 sps:$4 sm:$0xff]  }
  0x6b   :  { %407 = vmatpush1.bf16.msra.mxu0 %v2152_v26  ;;  %1943 = vmatpush3.bf16.msra.mxu1 %v2155_v27  ;;  %v2188_v26 = vld [vmem:[#allocation5 + $0x180] ss:$12 sps:$4 sm:$0xff]   ;;  %v2191_v27 = vld [vmem:[#allocation5 + $0x188] ss:$12 sps:$4 sm:$0xff]  }
  0x6c   :  { %408 = vmatprep.subr.bf16.mxu0 %v2158_v28  ;;  %1944 = vmatprep.subr.bf16.mxu1 %v2441_v1  ;;  %v247_v28 = vld [vmem:[#allocation8 + $0x2] ss:$8 sm:$0x7] }
  0x6d   :  { %v258_v32 = vrot.slane %v247_v28, %v2535_v35 }
  0x6f   :  { %409 = vmatpush1.bf16.msra.mxu0 %v2156_v29  ;;  %1945 = vmatpush3.bf16.msra.mxu1 %v2159_v30  ;;  %v254_v29 = vrot.slane %v247_v28, %v2533_v33 }
  0x70   :  { %1950 = vmatprep.subr.bf16.mxu1 %v2441_v1  ;;  %672 = vmatprep.subr.bf16.mxu0 %v2162_v4  ;;  %v2199_v4 = vld [vmem:[#allocation5 + $0x1b8] ss:$12 sps:$4 sm:$0xff]  }
 0x124   :  { %v150_v37 = vpop.f32.mrb[0].mxu0  ;;  %v191_v41 = vpop.f32.mrb[0].mxu1 }
 0x125   :  { %v151_v39 = vadd.f32 %v150_v37, %v84_v36  ;;  %v152_v40 = vpop.f32.mrb[1].mxu0  ;;  %v1928_v43 = vpop.f32.mrb[1].mxu1  ;;  %v192_v57 = vadd.f32 %v191_v41, %v92_v54 }
 0x126   :  { %v154_v42 = vpop.f32.mrb[2].mxu0  ;;  %v194_v46 = vpop.f32.mrb[2].mxu1  ;;  %v153_v47 = vadd.f32 %v152_v40, %v88_v38 }
 0x127   :  { %v1713_v44 = vmul.f32 -1.442695, %v151_v39  ;;  %v155_v45 = vpop.f32.mrb[3].mxu0  ;;  %v1929_v48 = vpop.f32.mrb[3].mxu1 }
 0x128   :  { %v1714_v49 = vmul.f32 -1.442695, %v153_v47  ;;  %v262_v48 = vrot.slane %v247_v28, %v2539_v52 }
 0x129   :  { %2272 = vpow2.f32 %v1713_v44 }
 0x12a   :  { %2274 = vpow2.f32 %v1714_v49 }
 0x133   :  { %v2273_v50 = vpop.eup %2272 }
 0x134   :  { %v200_v51 = vadd.f32 1.0, %v2273_v50  ;;  %v2275_v53 = vpop.eup %2274  ;;  %v248_v50 = vld [vmem:[#allocation8 + $0x3] ss:$0 sm:$0xff] }
 0x135   :  { %v206_v55 = vadd.f32 1.0, %v2275_v53 }
 0x136   :  { %2276 = vrcp.f32 %v200_v51 }
 0x137   :  { %2278 = vrcp.f32 %v206_v55 }
 0x140   :  { %v2277_v58 = vpop.eup %2276 }
 0x141   :  { %v209_v59 = vmul.f32 %v2277_v58, %v78_v56  ;;  %v2279_v61 = vpop.eup %2278 }
 0x142   :  { %v212_v62 = vsub.f32 1.0, %v2279_v61  ;;  %v2194_v61 = vld [vmem:[#allocation5 + $0x19c] ss:$12 sps:$4 sm:$0xff]  }
 0x143   :  { %v210_v60 = vadd.f32 %v209_v59, %v192_v57 }
 0x145   :  { %2280 = vtanh.f32 %v210_v60 }
 0x14f   :  { %v2281_v63 = vpop.eup %2280 }
 0x150   :  { %v213_v2 = vmul.f32 %v2281_v63, %v212_v62  ;;  %v2192_v62 = vld [vmem:[#allocation5 + $0x198] ss:$12 sps:$4 sm:$0xff]   ;;  %v2195_v63 = vld [vmem:[#allocation5 + $0x1a0] ss:$12 sps:$4 sm:$0xff]  }
 0x152   :  { %v249_v3 = vpack.c.bf16 %v213_v2, %v213_v2  ;;  %v2198_v2 = vld [vmem:[#allocation5 + $0x1b4] ss:$12 sps:$4 sm:$0xff]  }
 0x154   :  { %427 = vmatmul.mubr.bf16.vlgmr.msra.gmra.mrb[4].mxu0 %v249_v3  ;;  %1947 = vmatmul.mubr.bf16.vlgmr.msra.gmra.mrb[4].mxu1 %v249_v3  ;;  %v2196_v3 = vld [vmem:[#allocation5 + $0x1b0] ss:$12 sps:$4 sm:$0xff]  }
 0x155   :  { %704 = vmatprep.mubr.bf16.mxu0 %v2440_v0  ;;  %1966 = vmatprep.mubr.msk.bf16.mxu1 %vm2442_vm0, %v2441_v1 }
 0x156   :  { %673 = vmatpush1.bf16.msra.mxu0 %v2160_v5  ;;  %1951 = vmatpush3.bf16.msra.mxu1 %v2163_v6  ;;  %v2202_v5 = vld [vmem:[#allocation5 + $0x1cc] ss:$12 sps:$4 sm:$0xff]   ;;  %v2203_v6 = vld [vmem:[#allocation5 + $0x1d0] ss:$12 sps:$4 sm:$0xff]  }
 0x157   :  { %1952 = vmatprep.subr.bf16.mxu1 %v2441_v1  ;;  %674 = vmatprep.subr.bf16.mxu0 %v2166_v7  ;;  %v2206_v7 = vld [vmem:[#allocation5 + $0x1e4] ss:$12 sps:$4 sm:$0xff]  }
 0x15a   :  { %675 = vmatpush1.bf16.msra.mxu0 %v2164_v8  ;;  %1953 = vmatpush3.bf16.msra.mxu1 %v2167_v9  ;;  %v2204_v8 = vld [vmem:[#allocation5 + $0x1e0] ss:$12 sps:$4 sm:$0xff]   ;;  %v2207_v9 = vld [vmem:[#allocation5 + $0x1e8] ss:$12 sps:$4 sm:$0xff]  }
 0x15b   :  { %1954 = vmatprep.subr.bf16.mxu1 %v2441_v1  ;;  %676 = vmatprep.subr.bf16.mxu0 %v2170_v10  ;;  %v2210_v10 = vld [vmem:[#allocation5 + $0x1fc] ss:$12 sps:$4 sm:$0xff]  }
 0x15e   :  { %677 = vmatpush1.bf16.msra.mxu0 %v2168_v11  ;;  %1955 = vmatpush3.bf16.msra.mxu1 %v2171_v12  ;;  %v2208_v11 = vld [vmem:[#allocation5 + $0x1f8] ss:$12 sps:$4 sm:$0xff]   ;;  %v2211_v12 = vld [vmem:[#allocation5 + $0x200] ss:$12 sps:$4 sm:$0xff]  }
 0x15f   :  { %1956 = vmatprep.subr.bf16.mxu1 %v2441_v1  ;;  %678 = vmatprep.subr.bf16.mxu0 %v2174_v13  ;;  %v2212_v13 = vld [vmem:[#allocation5 + $0x210] ss:$12 sps:$4 sm:$0xff]  }
 0x162   :  { %679 = vmatpush1.bf16.msra.mxu0 %v2172_v14  ;;  %1957 = vmatpush3.bf16.msra.mxu1 %v2175_v15  ;;  %v2214_v14 = vld [vmem:[#allocation5 + $0x214] ss:$12 sps:$4 sm:$0xff]   ;;  %v2215_v15 = vld [vmem:[#allocation5 + $0x218] ss:$12 sps:$4 sm:$0xff]  }
 0x163   :  { %1958 = vmatprep.subr.bf16.mxu1 %v2441_v1  ;;  %680 = vmatprep.subr.bf16.mxu0 %v2178_v16  ;;  %v2218_v16 = vld [vmem:[#allocation5 + $0x22c] ss:$12 sps:$4 sm:$0xff]  }
 0x166   :  { %681 = vmatpush1.bf16.msra.mxu0 %v2176_v17  ;;  %1959 = vmatpush3.bf16.msra.mxu1 %v2179_v18  ;;  %v2216_v17 = vld [vmem:[#allocation5 + $0x228] ss:$12 sps:$4 sm:$0xff]   ;;  %v2219_v18 = vld [vmem:[#allocation5 + $0x230] ss:$12 sps:$4 sm:$0xff]  }
 0x167   :  { %1960 = vmatprep.subr.bf16.mxu1 %v2441_v1  ;;  %682 = vmatprep.subr.bf16.mxu0 %v2182_v20  ;;  %v2220_v20 = vld [vmem:[#allocation5 + $0x240] ss:$12 sps:$4 sm:$0xff]  }
 0x16a   :  { %683 = vmatpush1.bf16.msra.mxu0 %v2180_v19  ;;  %1961 = vmatpush3.bf16.msra.mxu1 %v2183_v21  ;;  %v2222_v19 = vld [vmem:[#allocation5 + $0x244] ss:$12 sps:$4 sm:$0xff]   ;;  %v2223_v21 = vld [vmem:[#allocation5 + $0x248] ss:$12 sps:$4 sm:$0xff]  }
 0x16b   :  { %684 = vmatprep.subr.bf16.mxu0 %v2186_v22  ;;  %1962 = vmatprep.subr.bf16.mxu1 %v2441_v1  ;;  %v525_v22 = vld [vmem:[#allocation8 + $0x4] ss:$8 sm:$0x7] }
 0x16e   :  { %685 = vmatpush1.bf16.msra.mxu0 %v2184_v23  ;;  %1963 = vmatpush3.bf16.msra.mxu1 %v2187_v24  ;;  %v532_v23 = vrot.slane %v525_v22, %v2533_v33 }
 0x16f   :  { %686 = vmatprep.subr.bf16.mxu0 %v2190_v25  ;;  %1964 = vmatprep.subr.bf16.mxu1 %v2441_v1 }
 0x172   :  { %687 = vmatpush1.bf16.msra.mxu0 %v2188_v26  ;;  %1965 = vmatpush3.bf16.msra.mxu1 %v2191_v27  ;;  %v536_v26 = vrot.slane %v525_v22, %v2535_v35 }
 0x173   :  { %1970 = vmatprep.subr.bf16.mxu1 %v2441_v1  ;;  %950 = vmatprep.subr.bf16.mxu0 %v2194_v61  ;;  %v2230_v61 = vld [vmem:[#allocation7 + $0x30] sm:$0xff]  }
 0x227   :  { %v428_v30 = vpop.f32.mrb[4].mxu0  ;;  %v469_v31 = vpop.f32.mrb[4].mxu1 }
 0x228   :  { %v429_v34 = vadd.f32 %v428_v30, %v254_v29  ;;  %v430_v36 = vpop.f32.mrb[5].mxu0  ;;  %v1948_v37 = vpop.f32.mrb[5].mxu1  ;;  %v470_v53 = vadd.f32 %v469_v31, %v262_v48 }
 0x229   :  { %v432_v38 = vpop.f32.mrb[6].mxu0  ;;  %v472_v39 = vpop.f32.mrb[6].mxu1  ;;  %v431_v43 = vadd.f32 %v430_v36, %v258_v32 }
 0x22a   :  { %v1739_v40 = vmul.f32 -1.442695, %v429_v34  ;;  %v433_v41 = vpop.f32.mrb[7].mxu0  ;;  %v1949_v42 = vpop.f32.mrb[7].mxu1 }
 0x22b   :  { %v1740_v44 = vmul.f32 -1.442695, %v431_v43  ;;  %v540_v42 = vrot.slane %v525_v22, %v2539_v52 }
 0x22c   :  { %2282 = vpow2.f32 %v1739_v40 }
 0x22d   :  { %2284 = vpow2.f32 %v1740_v44  ;;  %v526_v44 = vld [vmem:[#allocation8 + $0x5] ss:$0 sm:$0xff] }
 0x236   :  { %v2283_v45 = vpop.eup %2282 }
 0x237   :  { %v478_v46 = vadd.f32 1.0, %v2283_v45  ;;  %v2285_v47 = vpop.eup %2284 }
 0x238   :  { %v484_v49 = vadd.f32 1.0, %v2285_v47 }
 0x239   :  { %2286 = vrcp.f32 %v478_v46 }
 0x23a   :  { %2288 = vrcp.f32 %v484_v49 }
 0x243   :  { %v2287_v51 = vpop.eup %2286 }
 0x244   :  { %v487_v54 = vmul.f32 %v2287_v51, %v248_v50  ;;  %v2289_v56 = vpop.eup %2288 }
 0x245   :  { %v490_v57 = vsub.f32 1.0, %v2289_v56  ;;  %v2225_v56 = vld [vmem:[#allocation7 + $0x8] sm:$0xff]  }
 0x246   :  { %v488_v55 = vadd.f32 %v487_v54, %v470_v53 }
 0x248   :  { %2290 = vtanh.f32 %v488_v55  ;;  %v2224_v55 = vld [vmem:[#allocation7] sm:$0xff]  }
 0x252   :  { %v2291_v58 = vpop.eup %2290 }
 0x253   :  { %v491_v59 = vmul.f32 %v2291_v58, %v490_v57  ;;  %v2226_v57 = vld [vmem:[#allocation7 + $0x10] sm:$0xff]   ;;  %v2227_v58 = vld [vmem:[#allocation7 + $0x18] sm:$0xff]  }
 0x255   :  { %v527_v60 = vpack.c.bf16 %v491_v59, %v491_v59  ;;  %v2228_v59 = vld [vmem:[#allocation7 + $0x20] sm:$0xff]  }
 0x257   :  { %705 = vmatmul.mubr.bf16.vlgmr.msra.gmra.mrb[8].mxu0 %v527_v60  ;;  %1967 = vmatmul.mubr.bf16.vlgmr.msra.gmra.mrb[8].mxu1 %v527_v60  ;;  %v2229_v60 = vld [vmem:[#allocation7 + $0x28] sm:$0xff]  }
 0x258   :  { %982 = vmatprep.mubr.bf16.mxu0 %v2440_v0  ;;  %1986 = vmatprep.mubr.msk.bf16.mxu1 %vm2442_vm0, %v2441_v1  ;;  %v2200_v0 = vld [vmem:[#allocation5 + $0x1c8] ss:$12 sps:$4 sm:$0xff]  }
 0x259   :  { %951 = vmatpush1.bf16.msra.mxu0 %v2192_v62  ;;  %1971 = vmatpush3.bf16.msra.mxu1 %v2195_v63  ;;  %v2231_v62 = vld [vmem:[#allocation7 + $0x38] sm:$0xff]   ;;  %v2232_v63 = vld [vmem:[#allocation7 + $0x40] sm:$0xff]  }
 0x25a   :  { %1972 = vmatprep.subr.bf16.mxu1 %v2441_v1  ;;  %952 = vmatprep.subr.bf16.mxu0 %v2198_v2  ;;  %v2233_v2 = vld [vmem:[#allocation7 + $0x48] sm:$0xff]  }
 0x25d   :  { %953 = vmatpush1.bf16.msra.mxu0 %v2196_v3  ;;  %1973 = vmatpush3.bf16.msra.mxu1 %v2199_v4  ;;  %v2234_v3 = vld [vmem:[#allocation7 + $0x50] sm:$0xff]   ;;  %v2235_v4 = vld [vmem:[#allocation7 + $0x58] sm:$0xff]  }
 0x25e   :  { %1974 = vmatprep.subr.bf16.mxu1 %v2441_v1  ;;  %954 = vmatprep.subr.bf16.mxu0 %v2202_v5  ;;  %v2236_v5 = vld [vmem:[#allocation7 + $0x60] sm:$0xff]  }
 0x261   :  { %955 = vmatpush1.bf16.msra.mxu0 %v2200_v0  ;;  %1975 = vmatpush3.bf16.msra.mxu1 %v2203_v6  ;;  %v2237_v0 = vld [vmem:[#allocation7 + $0x68] sm:$0xff]  }
 0x262   :  { %1976 = vmatprep.subr.bf16.mxu1 %v2441_v1  ;;  %956 = vmatprep.subr.bf16.mxu0 %v2206_v7  ;;  %v803_v6 = vld [vmem:[#allocation8 + $0x6] ss:$8 sm:$0x7] }
 0x263   :  { %v810_v7 = vrot.slane %v803_v6, %v2533_v33 }
 0x265   :  { %957 = vmatpush1.bf16.msra.mxu0 %v2204_v8  ;;  %1977 = vmatpush3.bf16.msra.mxu1 %v2207_v9 }
 0x266   :  { %1978 = vmatprep.subr.bf16.mxu1 %v2441_v1  ;;  %958 = vmatprep.subr.bf16.mxu0 %v2210_v10  ;;  %v814_v10 = vrot.slane %v803_v6, %v2535_v35  ;;  %v804_v35 = vld [vmem:[#allocation8 + $0x7] ss:$0 sm:$0xff] }
 0x269   :  { %959 = vmatpush1.bf16.msra.mxu0 %v2208_v11  ;;  %1979 = vmatpush3.bf16.msra.mxu1 %v2211_v12 }
 0x26a   :  { %1980 = vmatprep.subr.bf16.mxu1 %v2441_v1  ;;  %960 = vmatprep.subr.bf16.mxu0 %v2214_v14 }
 0x26d   :  { %961 = vmatpush1.bf16.msra.mxu0 %v2212_v13  ;;  %1981 = vmatpush3.bf16.msra.mxu1 %v2215_v15 }
 0x26e   :  { %962 = vmatprep.subr.bf16.mxu0 %v2218_v16  ;;  %1982 = vmatprep.subr.bf16.mxu1 %v2441_v1 }
 0x271   :  { %963 = vmatpush1.bf16.msra.mxu0 %v2216_v17  ;;  %1983 = vmatpush3.bf16.msra.mxu1 %v2219_v18 }
 0x272   :  { %964 = vmatprep.subr.bf16.mxu0 %v2222_v19  ;;  %1984 = vmatprep.subr.bf16.mxu1 %v2441_v1 }
 0x275   :  { %965 = vmatpush1.bf16.msra.mxu0 %v2220_v20  ;;  %1985 = vmatpush3.bf16.msra.mxu1 %v2223_v21 }
 0x276   :  { %1990 = vmatprep.subr.bf16.mxu0 %v2441_v1  ;;  %2010 = vmatprep.subr.bf16.mxu1 %v2441_v1 }
 0x32a   :  { %v706_v24 = vpop.f32.mrb[8].mxu0  ;;  %v747_v25 = vpop.f32.mrb[8].mxu1 }
 0x32b   :  { %v707_v27 = vadd.f32 %v706_v24, %v532_v23  ;;  %v708_v28 = vpop.f32.mrb[9].mxu0  ;;  %v1968_v29 = vpop.f32.mrb[9].mxu1  ;;  %v748_v46 = vadd.f32 %v747_v25, %v540_v42  ;;  %v818_v23 = vrot.slane %v803_v6, %v2539_v52  ;;  %v2239_v52 = vld [vmem:[#allocation7 + $0x78] sm:$0xff]   ;;  %v2245_v42 = vld [vmem:[#allocation7 + $0xa8] sm:$0xff]  }
 0x32c   :  { %v710_v30 = vpop.f32.mrb[10].mxu0  ;;  %v750_v31 = vpop.f32.mrb[10].mxu1  ;;  %v709_v37 = vadd.f32 %v708_v28, %v536_v26  ;;  %v2255_v6 = vld [vmem:[#allocation7 + $0xf8] sm:$0xff]  }
 0x32d   :  { %v1765_v32 = vmul.f32 -1.442695, %v707_v27  ;;  %v711_v34 = vpop.f32.mrb[11].mxu0  ;;  %v1969_v36 = vpop.f32.mrb[11].mxu1 }
 0x32e   :  { %v1766_v38 = vmul.f32 -1.442695, %v709_v37  ;;  %v2238_v36 = vld [vmem:[#allocation7 + $0x70] sm:$0xff]   ;;  %v2240_v37 = vld [vmem:[#allocation7 + $0x80] sm:$0xff]  }
 0x32f   :  { %2292 = vpow2.f32 %v1765_v32 }
 0x330   :  { %2294 = vpow2.f32 %v1766_v38  ;;  %v2241_v38 = vld [vmem:[#allocation7 + $0x88] sm:$0xff]  }
 0x339   :  { %v2293_v39 = vpop.eup %2292 }
 0x33a   :  { %v756_v40 = vadd.f32 1.0, %v2293_v39  ;;  %v2295_v41 = vpop.eup %2294  ;;  %v2242_v39 = vld [vmem:[#allocation7 + $0x90] sm:$0xff]  }
 0x33b   :  { %v762_v43 = vadd.f32 1.0, %v2295_v41  ;;  %v2244_v41 = vld [vmem:[#allocation7 + $0xa0] sm:$0xff]  }
 0x33c   :  { %2296 = vrcp.f32 %v756_v40  ;;  %v2243_v40 = vld [vmem:[#allocation7 + $0x98] sm:$0xff]  }
 0x33d   :  { %2298 = vrcp.f32 %v762_v43  ;;  %v1064_v43 = vld [vmem:[#allocation8 + $0x18] ss:$0 sm:$0xff] }
 0x346   :  { %v2297_v45 = vpop.eup %2296 }
 0x347   :  { %v765_v47 = vmul.f32 %v2297_v45, %v526_v44  ;;  %v2299_v49 = vpop.eup %2298 }
 0x348   :  { %v768_v50 = vsub.f32 1.0, %v2299_v49 }
 0x349   :  { %v766_v48 = vadd.f32 %v765_v47, %v748_v46 }
 0x34b   :  { %2300 = vtanh.f32 %v766_v48 }
 0x355   :  { %v2301_v51 = vpop.eup %2300 }
 0x356   :  { %v769_v53 = vmul.f32 %v2301_v51, %v768_v50  ;;  %v2246_v51 = vld [vmem:[#allocation7 + $0xb0] sm:$0xff]  }
 0x358   :  { %v805_v54 = vpack.c.bf16 %v769_v53, %v769_v53  ;;  %v2247_v53 = vld [vmem:[#allocation7 + $0xb8] sm:$0xff]  }
 0x35a   :  { %983 = vmatmul.mubr.bf16.vlgmr.msra.gmra.mrb[12].mxu0 %v805_v54  ;;  %1987 = vmatmul.mubr.bf16.vlgmr.msra.gmra.mrb[12].mxu1 %v805_v54  ;;  %v2248_v54 = vld [vmem:[#allocation7 + $0xc0] sm:$0xff]  }
 0x35b   :  { %2006 = vmatprep.mubr.msk.bf16.mxu0 %vm2442_vm0, %v2441_v1  ;;  %2026 = vmatprep.mubr.msk.bf16.mxu1 %vm2442_vm0, %v2441_v1 }
 0x35c   :  { %1991 = vmatpush3.bf16.msra.mxu0 %v2224_v55  ;;  %2011 = vmatpush3.bf16.msra.mxu1 %v2232_v63  ;;  %v2249_v55 = vld [vmem:[#allocation7 + $0xc8] sm:$0xff]  }
 0x35d   :  { %1992 = vmatprep.subr.bf16.mxu0 %v2441_v1  ;;  %2012 = vmatprep.subr.bf16.mxu1 %v2441_v1 }
 0x360   :  { %1993 = vmatpush3.bf16.msra.mxu0 %v2225_v56  ;;  %2013 = vmatpush3.bf16.msra.mxu1 %v2233_v2  ;;  %v2250_v56 = vld [vmem:[#allocation7 + $0xd0] sm:$0xff]  }
 0x361   :  { %1994 = vmatprep.subr.bf16.mxu0 %v2441_v1  ;;  %2014 = vmatprep.subr.bf16.mxu1 %v2441_v1 }
 0x364   :  { %1995 = vmatpush3.bf16.msra.mxu0 %v2226_v57  ;;  %2015 = vmatpush3.bf16.msra.mxu1 %v2234_v3  ;;  %v2251_v57 = vld [vmem:[#allocation7 + $0xd8] sm:$0xff]  }
 0x365   :  { %1996 = vmatprep.subr.bf16.mxu0 %v2441_v1  ;;  %2016 = vmatprep.subr.bf16.mxu1 %v2441_v1 }
 0x368   :  { %1997 = vmatpush3.bf16.msra.mxu0 %v2227_v58  ;;  %2017 = vmatpush3.bf16.msra.mxu1 %v2235_v4  ;;  %v2252_v58 = vld [vmem:[#allocation7 + $0xe0] sm:$0xff]  }
 0x369   :  { %1998 = vmatprep.subr.bf16.mxu0 %v2441_v1  ;;  %2018 = vmatprep.subr.bf16.mxu1 %v2441_v1 }
 0x36c   :  { %1999 = vmatpush3.bf16.msra.mxu0 %v2228_v59  ;;  %2019 = vmatpush3.bf16.msra.mxu1 %v2236_v5  ;;  %v2253_v59 = vld [vmem:[#allocation7 + $0xe8] sm:$0xff]  }
 0x36d   :  { %2000 = vmatprep.subr.bf16.mxu0 %v2441_v1  ;;  %2020 = vmatprep.subr.bf16.mxu1 %v2441_v1 }
 0x370   :  { %2001 = vmatpush3.bf16.msra.mxu0 %v2229_v60  ;;  %2021 = vmatpush3.bf16.msra.mxu1 %v2237_v0  ;;  %v1171_v60 = vld [vmem:[#allocation8 + $0x19] ss:$0 sm:$0xff]  ;;  %v2254_v0 = vld [vmem:[#allocation7 + $0xf0] sm:$0xff]  }
 0x371   :  { %2002 = vmatprep.subr.bf16.mxu0 %v2441_v1  ;;  %2022 = vmatprep.subr.bf16.mxu1 %v2441_v1 }
 0x374   :  { %2003 = vmatpush3.bf16.msra.mxu0 %v2230_v61  ;;  %2023 = vmatpush3.bf16.msra.mxu1 %v2238_v36 }
 0x375   :  { %2004 = vmatprep.subr.bf16.mxu0 %v2441_v1  ;;  %2024 = vmatprep.subr.bf16.mxu1 %v2441_v1 }
 0x378   :  { %2005 = vmatpush3.bf16.msra.mxu0 %v2231_v62  ;;  %2025 = vmatpush3.bf16.msra.mxu1 %v2239_v52  ;;  %v2270_v52 = vld [vmem:[#allocation7 + $0x170] sm:$0xff]  }
 0x379   :  { %2030 = vmatprep.subr.bf16.mxu0 %v2441_v1  ;;  %2050 = vmatprep.subr.bf16.mxu1 %v2441_v1 }
 0x42d   :  { %v984_v8 = vpop.f32.mrb[12].mxu0  ;;  %v1025_v9 = vpop.f32.mrb[12].mxu1 }
 0x42e   :  { %v985_v11 = vadd.f32 %v984_v8, %v810_v7  ;;  %v986_v12 = vpop.f32.mrb[13].mxu0  ;;  %v1988_v13 = vpop.f32.mrb[13].mxu1  ;;  %v1026_v26 = vadd.f32 %v1025_v9, %v818_v23  ;;  %v2256_v7 = vld [vmem:[#allocation7 + $0x100] sm:$0xff]   ;;  %v2257_v8 = vld [vmem:[#allocation7 + $0x108] sm:$0xff]   ;;  %v2258_v9 = vld [vmem:[#allocation7 + $0x110] sm:$0xff]  }
 0x42f   :  { %v988_v14 = vpop.f32.mrb[14].mxu0  ;;  %v1028_v15 = vpop.f32.mrb[14].mxu1  ;;  %v987_v19 = vadd.f32 %v986_v12, %v814_v10  ;;  %v2259_v10 = vld [vmem:[#allocation7 + $0x118] sm:$0xff]   ;;  %v2261_v12 = vld [vmem:[#allocation7 + $0x128] sm:$0xff]  }
 0x430   :  { %v1791_v16 = vmul.f32 -1.442695, %v985_v11  ;;  %v989_v17 = vpop.f32.mrb[15].mxu0  ;;  %v1989_v18 = vpop.f32.mrb[15].mxu1  ;;  %v2260_v11 = vld [vmem:[#allocation7 + $0x120] sm:$0xff]   ;;  %v2265_v23 = vld [vmem:[#allocation7 + $0x148] sm:$0xff]  }
 0x431   :  { %v1792_v20 = vmul.f32 -1.442695, %v987_v19  ;;  %v1278_v13 = vld [vmem:[#allocation8 + $0x1a] ss:$0 sm:$0xff] }
 0x432   :  { %2302 = vpow2.f32 %v1791_v16 }
 0x433   :  { %2304 = vpow2.f32 %v1792_v20 }
 0x43c   :  { %v2303_v21 = vpop.eup %2302 }
 0x43d   :  { %v1034_v22 = vadd.f32 1.0, %v2303_v21  ;;  %v2305_v33 = vpop.eup %2304  ;;  %v2262_v21 = vld [vmem:[#allocation7 + $0x130] sm:$0xff]  }
 0x43e   :  { %v1040_v24 = vadd.f32 1.0, %v2305_v33  ;;  %v2264_v33 = vld [vmem:[#allocation7 + $0x140] sm:$0xff]  }
 0x43f   :  { %2306 = vrcp.f32 %v1034_v22  ;;  %v2263_v22 = vld [vmem:[#allocation7 + $0x138] sm:$0xff]  }
 0x440   :  { %2308 = vrcp.f32 %v1040_v24  ;;  %v2266_v24 = vld [vmem:[#allocation7 + $0x150] sm:$0xff]  }
 0x449   :  { %v2307_v25 = vpop.eup %2306 }
 0x44a   :  { %v1043_v27 = vmul.f32 %v2307_v25, %v804_v35  ;;  %v2309_v29 = vpop.eup %2308  ;;  %v2267_v35 = vld [vmem:[#allocation7 + $0x158] sm:$0xff]   ;;  %v2268_v25 = vld [vmem:[#allocation7 + $0x160] sm:$0xff]  }
 0x44b   :  { %v1046_v30 = vsub.f32 1.0, %v2309_v29 }
 0x44c   :  { %v1044_v28 = vadd.f32 %v1043_v27, %v1026_v26  ;;  %v2269_v26 = vld [vmem:[#allocation7 + $0x168] sm:$0xff]   ;;  %v1385_v27 = vld [vmem:[#allocation8 + $0x1b] ss:$0 sm:$0xff] }
 0x44e   :  { %2310 = vtanh.f32 %v1044_v28 }
 0x458   :  { %v2311_v31 = vpop.eup %2310 }
 0x459   :  { %v1047_v32 = vmul.f32 %v2311_v31, %v1046_v30 }
 0x45b   :  { %v1065_v34 = vpack.c.bf16 %v1047_v32, %v1047_v32 }
 0x45d   :  { %2007 = vmatmul.mubr.bf16.vlgmr.msra.gmra.mrb[16].mxu0 %v1065_v34 }
 0x45e   :  { %2046 = vmatprep.mubr.msk.bf16.mxu0 %vm2442_vm0, %v2441_v1  ;;  %2031 = vmatpush3.bf16.msra.mxu0 %v2240_v37  ;;  %v2271_v37 = vld [vmem:[#allocation7 + $0x178] sm:$0xff]  }
 0x45f   :  { %2032 = vmatprep.subr.bf16.mxu0 %v2441_v1 }
 0x462   :  { %2033 = vmatpush3.bf16.msra.mxu0 %v2241_v38  ;;  %v1492_v38 = vld [vmem:[#allocation8 + $0x1c] ss:$0 sm:$0xff] }
 0x463   :  { %2034 = vmatprep.subr.bf16.mxu0 %v2441_v1 }
 0x466   :  { %2035 = vmatpush3.bf16.msra.mxu0 %v2242_v39 }
 0x467   :  { %2036 = vmatprep.subr.bf16.mxu0 %v2441_v1 }
 0x46a   :  { %2037 = vmatpush3.bf16.msra.mxu0 %v2243_v40 }
 0x46b   :  { %2038 = vmatprep.subr.bf16.mxu0 %v2441_v1 }
 0x46e   :  { %2039 = vmatpush3.bf16.msra.mxu0 %v2244_v41 }
 0x46f   :  { %2040 = vmatprep.subr.bf16.mxu0 %v2441_v1 }
 0x472   :  { %2041 = vmatpush3.bf16.msra.mxu0 %v2245_v42 }
 0x473   :  { %2042 = vmatprep.subr.bf16.mxu0 %v2441_v1 }
 0x476   :  { %2043 = vmatpush3.bf16.msra.mxu0 %v2246_v51 }
 0x477   :  { %2044 = vmatprep.subr.bf16.mxu0 %v2441_v1 }
 0x47a   :  { %2045 = vmatpush3.bf16.msra.mxu0 %v2247_v53 }
 0x47b   :  { %2070 = vmatprep.subr.bf16.mxu0 %v2441_v1 }
 0x530   :  { %v1148_v44 = vpop.f32.mrb[16].mxu0 }
 0x531   :  { %v1149_v45 = vadd.f32 %v1148_v44, %v1064_v43  ;;  %v2008_v46 = vpop.f32.mrb[17].mxu0 }
 0x532   :  { %v1151_v47 = vpop.f32.mrb[18].mxu0  ;;  %v1599_v46 = vld [vmem:[#allocation8 + $0x1d] ss:$0 sm:$0xff] }
 0x533   :  { %v1154_v48 = vmax.f32 %v1149_v45, 0.0  ;;  %v2009_v49 = vpop.f32.mrb[19].mxu0 }
 0x535   :  { %v1172_v50 = vpack.c.bf16 %v1154_v48, %v1154_v48 }
 0x537   :  { %2027 = vmatmul.mubr.bf16.vlgmr.msra.gmra.mrb[16].mxu1 %v1172_v50 }
 0x538   :  { %2066 = vmatprep.mubr.msk.bf16.mxu1 %vm2442_vm0, %v2441_v1  ;;  %2051 = vmatpush3.bf16.msra.mxu1 %v2248_v54 }
 0x539   :  { %2052 = vmatprep.subr.bf16.mxu1 %v2441_v1 }
 0x53c   :  { %2053 = vmatpush3.bf16.msra.mxu1 %v2249_v55 }
 0x53d   :  { %2054 = vmatprep.subr.bf16.mxu1 %v2441_v1 }
 0x540   :  { %2055 = vmatpush3.bf16.msra.mxu1 %v2250_v56 }
 0x541   :  { %2056 = vmatprep.subr.bf16.mxu1 %v2441_v1 }
 0x544   :  { %2057 = vmatpush3.bf16.msra.mxu1 %v2251_v57 }
 0x545   :  { %2058 = vmatprep.subr.bf16.mxu1 %v2441_v1 }
 0x548   :  { %2059 = vmatpush3.bf16.msra.mxu1 %v2252_v58 }
 0x549   :  { %2060 = vmatprep.subr.bf16.mxu1 %v2441_v1 }
 0x54c   :  { %2061 = vmatpush3.bf16.msra.mxu1 %v2253_v59 }
 0x54d   :  { %2062 = vmatprep.subr.bf16.mxu1 %v2441_v1 }
 0x550   :  { %2063 = vmatpush3.bf16.msra.mxu1 %v2254_v0 }
 0x551   :  { %2064 = vmatprep.subr.bf16.mxu1 %v2441_v1 }
 0x554   :  { %2065 = vmatpush3.bf16.msra.mxu1 %v2255_v6 }
 0x555   :  { %2090 = vmatprep.subr.bf16.mxu1 %v2441_v1 }
 0x60a   :  { %v1255_v61 = vpop.f32.mrb[16].mxu1 }
 0x60b   :  { %v1256_v62 = vadd.f32 %v1255_v61, %v1171_v60  ;;  %v2028_v63 = vpop.f32.mrb[17].mxu1 }
 0x60c   :  { %v1258_v2 = vpop.f32.mrb[18].mxu1 }
 0x60d   :  { %v1261_v3 = vmax.f32 %v1256_v62, 0.0  ;;  %v2029_v4 = vpop.f32.mrb[19].mxu1 }
 0x60f   :  { %v1279_v5 = vpack.c.bf16 %v1261_v3, %v1261_v3 }
 0x611   :  { %2047 = vmatmul.mubr.bf16.vlgmr.msra.gmra.mrb[20].mxu0 %v1279_v5 }
 0x612   :  { %2086 = vmatprep.mubr.msk.bf16.mxu0 %vm2442_vm0, %v2441_v1  ;;  %2071 = vmatpush3.bf16.msra.mxu0 %v2256_v7 }
 0x613   :  { %2072 = vmatprep.subr.bf16.mxu0 %v2441_v1 }
 0x616   :  { %2073 = vmatpush3.bf16.msra.mxu0 %v2257_v8 }
 0x617   :  { %2074 = vmatprep.subr.bf16.mxu0 %v2441_v1 }
 0x61a   :  { %2075 = vmatpush3.bf16.msra.mxu0 %v2258_v9 }
 0x61b   :  { %2076 = vmatprep.subr.bf16.mxu0 %v2441_v1 }
 0x61e   :  { %2077 = vmatpush3.bf16.msra.mxu0 %v2259_v10 }
 0x61f   :  { %2078 = vmatprep.subr.bf16.mxu0 %v2441_v1 }
 0x622   :  { %2079 = vmatpush3.bf16.msra.mxu0 %v2260_v11 }
 0x623   :  { %2080 = vmatprep.subr.bf16.mxu0 %v2441_v1 }
 0x626   :  { %2081 = vmatpush3.bf16.msra.mxu0 %v2261_v12 }
 0x627   :  { %2082 = vmatprep.subr.bf16.mxu0 %v2441_v1 }
 0x62a   :  { %2083 = vmatpush3.bf16.msra.mxu0 %v2262_v21 }
 0x62b   :  { %2084 = vmatprep.subr.bf16.mxu0 %v2441_v1 }
 0x62e   :  { %2085 = vmatpush3.bf16.msra.mxu0 %v2263_v22 }
 0x6e4   :  { %v1362_v14 = vpop.f32.mrb[20].mxu0 }
 0x6e5   :  { %v1363_v15 = vadd.f32 %v1362_v14, %v1278_v13  ;;  %v2048_v16 = vpop.f32.mrb[21].mxu0 }
 0x6e6   :  { %v1365_v17 = vpop.f32.mrb[22].mxu0 }
 0x6e7   :  { %v1368_v18 = vmax.f32 %v1363_v15, 0.0  ;;  %v2049_v19 = vpop.f32.mrb[23].mxu0 }
 0x6e9   :  { %v1386_v20 = vpack.c.bf16 %v1368_v18, %v1368_v18 }
 0x6eb   :  { %2067 = vmatmul.mubr.bf16.vlgmr.msra.gmra.mrb[20].mxu1 %v1386_v20 }
 0x6ec   :  { %2106 = vmatprep.mubr.msk.bf16.mxu1 %vm2442_vm0, %v2441_v1  ;;  %2091 = vmatpush3.bf16.msra.mxu1 %v2264_v33 }
 0x6ed   :  { %2092 = vmatprep.subr.bf16.mxu1 %v2441_v1 }
 0x6f0   :  { %2093 = vmatpush3.bf16.msra.mxu1 %v2265_v23 }
 0x6f1   :  { %2094 = vmatprep.subr.bf16.mxu1 %v2441_v1 }
 0x6f4   :  { %2095 = vmatpush3.bf16.msra.mxu1 %v2266_v24 }
 0x6f5   :  { %2096 = vmatprep.subr.bf16.mxu1 %v2441_v1 }
 0x6f8   :  { %2097 = vmatpush3.bf16.msra.mxu1 %v2267_v35 }
 0x6f9   :  { %2098 = vmatprep.subr.bf16.mxu1 %v2441_v1 }
 0x6fc   :  { %2099 = vmatpush3.bf16.msra.mxu1 %v2268_v25 }
 0x6fd   :  { %2100 = vmatprep.subr.bf16.mxu1 %v2441_v1 }
 0x700   :  { %2101 = vmatpush3.bf16.msra.mxu1 %v2269_v26 }
 0x701   :  { %2102 = vmatprep.subr.bf16.mxu1 %v2441_v1 }
 0x704   :  { %2103 = vmatpush3.bf16.msra.mxu1 %v2270_v52 }
 0x705   :  { %2104 = vmatprep.subr.bf16.mxu1 %v2441_v1 }
 0x708   :  { %2105 = vmatpush3.bf16.msra.mxu1 %v2271_v37 }
 0x7be   :  { %v1469_v28 = vpop.f32.mrb[20].mxu1 }
 0x7bf   :  { %v1470_v29 = vadd.f32 %v1469_v28, %v1385_v27  ;;  %v2068_v30 = vpop.f32.mrb[21].mxu1 }
 0x7c0   :  { %v1472_v31 = vpop.f32.mrb[22].mxu1 }
 0x7c1   :  { %v1475_v32 = vmax.f32 %v1470_v29, 0.0  ;;  %v2069_v34 = vpop.f32.mrb[23].mxu1 }
 0x7c3   :  { %v1493_v36 = vpack.c.bf16 %v1475_v32, %v1475_v32 }
 0x7c5   :  { %2087 = vmatmul.mubr.bf16.vlgmr.msra.gmra.mrb[24].mxu0 %v1493_v36 }
 0x898   :  { %v1576_v39 = vpop.f32.mrb[24].mxu0 }
 0x899   :  { %v1577_v40 = vadd.f32 %v1576_v39, %v1492_v38  ;;  %v2088_v41 = vpop.f32.mrb[25].mxu0 }
 0x89a   :  { %v1579_v42 = vpop.f32.mrb[26].mxu0 }
 0x89b   :  { %v1582_v43 = vmax.f32 %v1577_v40, 0.0  ;;  %v2089_v44 = vpop.f32.mrb[27].mxu0 }
 0x89d   :  { %v1600_v45 = vpack.c.bf16 %v1582_v43, %v1582_v43 }
 0x89f   :  { %2107 = vmatmul.mubr.bf16.vlgmr.msra.gmra.mrb[24].mxu1 %v1600_v45 }
 0x972   :  { %v1683_v47 = vpop.f32.mrb[24].mxu1 }
 0x973   :  { %v1684_v48 = vadd.f32 %v1683_v47, %v1599_v46  ;;  %v2108_v49 = vpop.f32.mrb[25].mxu1 }
 0x974   :  { %v1686_v1 = vpop.f32.mrb[26].mxu1 }
 0x975   :  { %v2109_v50 = vpop.f32.mrb[27].mxu1  ;;  %1690 = vst.msk [vmem:[#allocation10] sm:$0x3] %vm1689_vm2, %v1684_v48 }
 0x976   :  { %2411 = shalt.err (!%p2408_p8)
}
 0x977   :  { %s2412_s17 = scalar_lea.hbm %s2648_s4, 32 }
 0x978   :  { %p2413_p9 = scmp.ne.s32.totalorder %s2648_s4, %s2412_s17  ;;  %p2416_p10 = scmp.lt.u32.totalorder %s2412_s17, %s2648_s4 }
 0x97a   :  { %p2418_p11 = pnand %p2416_p10, %p2413_p9 }
 0x97c   :  { %2421 = shalt.err (!%p2418_p11)
}
 0x97d   :  { %1700 = dma.vmem_to_hbm [thread:$0]  %s1698_s1, 32, %s2648_s4, [#allocation4]  }
 0x97e   :  { %2428 = dma.done.wait [#allocation4], 32  }
 0x97f   :  { %2429 = vsyncadd [#allocation4], 4294967264 }
 0x980   :  { %1704 = vsyncpa [#allocation3], 1 }
 0x981   :  { %1705 = vsyncpa [#allocation6], 1 }
 0x982   :  { %1706 = vsyncpa [#allocation9], 1 }
 0x983   :  { %1707 = vsyncpa [#allocation4], 1 }

</bundles_post_ra>
